<compile_context>
chip_gen: v7x
topology: tpu7x:2x2x1
jax: 0.10.0
libtpu: 0.0.40
codegen_flags: <defaults>
</compile_context>

<pallas_src>
import functools

import jax
import jax.numpy as jnp
from jax.experimental import pallas as pl
from jax.experimental.pallas import tpu as pltpu

_VMEM_LIMIT_BYTES = 32 * 1024 * 1024     # safe scoped-VMEM request on v5e/v6e/v7x
_TARGET_BLOCK_BYTES = 4 * 1024 * 1024    # per-block cap so 2x(in+out) buffers fit easily


# ----------------------------- tile selection -------------------------------


def _channel_tile(C: int, per_channel_bytes: int,
                  target_bytes: int = _TARGET_BLOCK_BYTES) -> int:
    """Largest channel tile (multiple of 8, or full C) fitting the byte budget."""
    c_tile = int(target_bytes // max(per_channel_bytes, 1))
    c_tile = (c_tile // 8) * 8
    if c_tile < 8:
        c_tile = 8
    return C if c_tile >= C else c_tile


def _elementwise_tiles(B: int, C: int, HW: int,
                       target_bytes: int = _TARGET_BLOCK_BYTES):
    """(c_tile, hw_tile) for elementwise kernels (lane tile multiple of 128)."""
    itemsize = 4  # kernels compute in f32
    base_c = min(C, 8)
    if B * base_c * HW * itemsize > target_bytes and HW >= 256:
        hw_tile = (target_bytes // max(B * base_c * itemsize, 1)) // 128 * 128
        hw_tile = max(hw_tile, 128)
        hw_tile = min(hw_tile, HW)
    else:
        hw_tile = HW
    # TODO(synk): for extreme batch sizes with tiny H*W, add a batch-tiling
    # grid axis as well (not needed for ResNet-style shapes).
    c_tile = _channel_tile(C, B * hw_tile * itemsize, target_bytes)
    return c_tile, hw_tile


# ----------------------------- kernels ---------------------------------------


def _bn_train_kernel(x_ref, w_ref, b_ref, o_ref, mean_ref, var_ref, *, eps, inv_n):
    # Fused single-pass path. x_ref: (B, C_TILE, HW); w/b/mean/var: (C_TILE, 1).
    x = x_ref[...].astype(jnp.float32)
    mean = jnp.sum(x, axis=(0, 2), keepdims=True) * inv_n              # (1, Ct, 1)
    ex2 = jnp.sum(x * x, axis=(0, 2), keepdims=True) * inv_n           # (1, Ct, 1)
    var = jnp.maximum(ex2 - mean * mean, 0.0)                          # biased var
    inv_std = jax.lax.rsqrt(var + eps)                                 # EUP
    scale = w_ref[...].astype(jnp.float32) * inv_std                   # (1, Ct, 1)
    shift = b_ref[...].astype(jnp.float32) - mean * scale              # (1, Ct, 1)
    o_ref[...] = (x * scale + shift).astype(o_ref.dtype)
    mean_ref[...] = mean.reshape(mean_ref.shape)
    var_ref[...] = var.reshape(var_ref.shape)


def _bn_stats_kernel(x_ref, sum_ref, sumsq_ref, *, hw_tile, hw_total):
    # Two-pass path, pass 1: accumulate per-channel sum / sumsq across HW tiles.
    hw_idx = pl.program_id(1)

    @pl.when(hw_idx == 0)
    def _():
        sum_ref[...] = jnp.zeros_like(sum_ref)
        sumsq_ref[...] = jnp.zeros_like(sumsq_ref)

    x = x_ref[...].astype(jnp.float32)                                 # (B, Ct, HWt)
    if hw_total % hw_tile != 0:
        # Partial last HW tile: mask padded lanes so the reduction stays exact.
        lane = jax.lax.broadcasted_iota(jnp.int32, x.shape, 2) + hw_idx * hw_tile
        x = jnp.where(lane < hw_total, x, 0.0)
    sum_ref[...] += jnp.sum(x, axis=(0, 2)).reshape(sum_ref.shape)
    sumsq_ref[...] += jnp.sum(x * x, axis=(0, 2)).reshape(sumsq_ref.shape)


def _bn_apply_kernel(x_ref, scale_ref, shift_ref, o_ref):
    # Pure FMA: stats already folded into per-channel scale/shift.
    x = x_ref[...].astype(jnp.float32)
    scale = scale_ref[...].astype(jnp.float32)   # (C_TILE, 1) -> broadcast
    shift = shift_ref[...].astype(jnp.float32)
    o_ref[...] = (x * scale + shift).astype(o_ref.dtype)


# --------------------------- pallas wrappers ---------------------------------


def _apply_scale_shift(x3, scale2, shift2, out_dtype, c_tile, hw_tile):
    """out = x * scale + shift, tiled over (C, HW). x3: (B, C, HW)."""
    B, C, HW = x3.shape
    grid = (pl.cdiv(C, c_tile), pl.cdiv(HW, hw_tile))
    return pl.pallas_call(
        _bn_apply_kernel,
        out_shape=jax.ShapeDtypeStruct((B, C, HW), out_dtype),
        grid=grid,
        in_specs=[
            pl.BlockSpec((B, c_tile, hw_tile), lambda c, s: (0, c, s)),
            pl.BlockSpec((c_tile, 1), lambda c, s: (c, 0)),
            pl.BlockSpec((c_tile, 1), lambda c, s: (c, 0)),
        ],
        out_specs=pl.BlockSpec((B, c_tile, hw_tile), lambda c, s: (0, c, s)),
        compiler_params=pltpu.CompilerParams(
            dimension_semantics=("parallel", "parallel"),
            vmem_limit_bytes=_VMEM_LIMIT_BYTES,
        ),
    )(x3, scale2, shift2)


def batchnorm2d_train_fwd(x, weight, bias, eps, *, c_tile=None, hw_tile=None):
    """Returns (out NCHW, batch_mean (C,), biased batch_var (C,))."""
    B, C, H, W = x.shape
    HW = H * W
    N = B * HW
    x3 = x.reshape(B, C, HW)
    per_channel_bytes = B * HW * 4

    # Two-pass when a minimal 8-channel slab would blow the block budget,
    # or when an HW tile was explicitly requested.
    two_pass = (hw_tile is not None) or (per_channel_bytes * 8 > _TARGET_BLOCK_BYTES)

    if two_pass:
        auto_c, auto_hw = _elementwise_tiles(B, C, HW)
        hw_t = hw_tile if hw_tile is not None else auto_hw
        c_t = c_tile if c_tile is not None else _channel_tile(C, B * hw_t * 4)

        sum_, sumsq = pl.pallas_call(
            functools.partial(_bn_stats_kernel, hw_tile=hw_t, hw_total=HW),
            out_shape=(
                jax.ShapeDtypeStruct((C, 1), jnp.float32),
                jax.ShapeDtypeStruct((C, 1), jnp.float32),
            ),
            grid=(pl.cdiv(C, c_t), pl.cdiv(HW, hw_t)),
            in_specs=[pl.BlockSpec((B, c_t, hw_t), lambda c, s: (0, c, s))],
            out_specs=(
                pl.BlockSpec((c_t, 1), lambda c, s: (c, 0)),
                pl.BlockSpec((c_t, 1), lambda c, s: (c, 0)),
            ),
            compiler_params=pltpu.CompilerParams(
                dimension_semantics=("parallel", "arbitrary"),
                vmem_limit_bytes=_VMEM_LIMIT_BYTES,
            ),
        )(x3)

        inv_n = 1.0 / float(N)
        mean = sum_.reshape(C) * inv_n
        var = jnp.maximum(sumsq.reshape(C) * inv_n - mean * mean, 0.0)
        scale = weight.astype(jnp.float32) * jax.lax.rsqrt(var + eps)
        shift = bias.astype(jnp.float32) - mean * scale
        out3 = _apply_scale_shift(x3, scale.reshape(C, 1), shift.reshape(C, 1),
                                  x.dtype, c_t, hw_t)
        return out3.reshape(B, C, H, W), mean, var

    # Fused single-pass path.
    w2 = weight.reshape(C, 1).astype(jnp.float32)
    b2 = bias.reshape(C, 1).astype(jnp.float32)
    if c_tile is None:
        c_tile = _channel_tile(C, per_channel_bytes)
    grid = (pl.cdiv(C, c_tile),)

    out3, mean, var = pl.pallas_call(
        functools.partial(_bn_train_kernel, eps=float(eps), inv_n=1.0 / float(N)),
        out_shape=(
            jax.ShapeDtypeStruct((B, C, HW), x.dtype),
            jax.ShapeDtypeStruct((C, 1), jnp.float32),
            jax.ShapeDtypeStruct((C, 1), jnp.float32),
        ),
        grid=grid,
        in_specs=[
            pl.BlockSpec((B, c_tile, HW), lambda c: (0, c, 0)),
            pl.BlockSpec((c_tile, 1), lambda c: (c, 0)),
            pl.BlockSpec((c_tile, 1), lambda c: (c, 0)),
        ],
        out_specs=(
            pl.BlockSpec((B, c_tile, HW), lambda c: (0, c, 0)),
            pl.BlockSpec((c_tile, 1), lambda c: (c, 0)),
            pl.BlockSpec((c_tile, 1), lambda c: (c, 0)),
        ),
        compiler_params=pltpu.CompilerParams(
            dimension_semantics=("parallel",),
            vmem_limit_bytes=_VMEM_LIMIT_BYTES,
        ),
    )(x3, w2, b2)

    return out3.reshape(B, C, H, W), mean.reshape(C), var.reshape(C)


def batchnorm2d_eval_fwd(x, weight, bias, running_mean, running_var, eps,
                         *, c_tile=None, hw_tile=None):
    B, C, H, W = x.shape
    HW = H * W
    x3 = x.reshape(B, C, HW)
    # Fold running stats + affine into per-channel scale/shift (tiny C-vector
    # math in plain JAX); the kernel is then a single FMA at the bandwidth floor.
    scale = weight.astype(jnp.float32) * jax.lax.rsqrt(
        running_var.astype(jnp.float32) + eps)
    shift = bias.astype(jnp.float32) - running_mean.astype(jnp.float32) * scale

    auto_c, auto_hw = _elementwise_tiles(B, C, HW)
    if c_tile is None:
        c_tile = auto_c
    if hw_tile is None:
        hw_tile = auto_hw

    out3 = _apply_scale_shift(x3, scale.reshape(C, 1), shift.reshape(C, 1),
                              x.dtype, c_tile, hw_tile)
    return out3.reshape(B, C, H, W)


# ------------------------------ module ----------------------------------------


class BatchNorm2d:
    """Pallas-backed equivalent of the reference PyTorch BatchNorm2d module."""

    def __init__(self, num_features: int, eps: float = 1e-5, momentum: float = 0.1):
        self.num_features = num_features
        self.eps = eps
        self.momentum = momentum
        self.weight = jnp.ones((num_features,), jnp.float32)
        self.bias = jnp.zeros((num_features,), jnp.float32)
        self.running_mean = jnp.zeros((num_features,), jnp.float32)
        self.running_var = jnp.ones((num_features,), jnp.float32)
        self.num_batches_tracked = jnp.array(0, jnp.int32)
        self.training = True

    def __call__(self, x):
        if self.training:
            out, mean, var = batchnorm2d_train_fwd(x, self.weight, self.bias, self.eps)
            m = self.momentum
            # Matching the reference module exactly — it feeds the *biased*
            # batch variance (unbiased=False) into running_var.
            self.running_mean = (1 - m) * self.running_mean + m * mean
            self.running_var = (1 - m) * self.running_var + m * var
            self.num_batches_tracked = self.num_batches_tracked + 1
            return out
        else:
            return batchnorm2d_eval_fwd(
                x, self.weight, self.bias, self.running_mean, self.running_var, self.eps
            )


# ------------------------------ reference --------------------------------------


def _reference_train(x, weight, bias, eps):
    mean = jnp.mean(x, axis=(0, 2, 3), keepdims=True)
    var = jnp.var(x, axis=(0, 2, 3), keepdims=True)  # ddof=0 (unbiased=False)
    w = weight.reshape(1, -1, 1, 1)
    b = bias.reshape(1, -1, 1, 1)
    return (x - mean) / jnp.sqrt(var + eps) * w + b


def _reference_eval(x, weight, bias, rm, rv, eps):
    mean = rm.reshape(1, -1, 1, 1)
    var = rv.reshape(1, -1, 1, 1)
    w = weight.reshape(1, -1, 1, 1)
    b = bias.reshape(1, -1, 1, 1)
    return (x - mean) / jnp.sqrt(var + eps) * w + b


if __name__ == "__main__":
    key = jax.random.PRNGKey(0)
    kx, kw, kb, kx2, kw2, kb2, kx3, kw3, kb3 = jax.random.split(key, 9)

    # ---- case 1: toy shape, fused single-pass path (single block) ----
    B, C, H, W = 2, 4, 16, 16
    x = jax.random.normal(kx, (B, C, H, W), jnp.float32)

    bn = BatchNorm2d(C)
    bn.weight = jax.random.normal(kw, (C,), jnp.float32) * 0.5 + 1.0
    bn.bias = jax.random.normal(kb, (C,), jnp.float32) * 0.1

    out_train = jax.block_until_ready(bn(x))
    ref_train = _reference_train(x, bn.weight, bn.bias, bn.eps)
    assert out_train.shape == (B, C, H, W)
    assert jnp.allclose(out_train, ref_train, atol=1e-5, rtol=1e-5)

    batch_mean = jnp.mean(x, axis=(0, 2, 3))
    batch_var = jnp.var(x, axis=(0, 2, 3))
    assert jnp.allclose(bn.running_mean, 0.1 * batch_mean, atol=1e-5)
    assert jnp.allclose(bn.running_var, 0.9 * 1.0 + 0.1 * batch_var, atol=1e-5)
    assert int(bn.num_batches_tracked) == 1

    bn.training = False
    out_eval = jax.block_until_ready(bn(x))
    ref_eval = _reference_eval(x, bn.weight, bn.bias,
                               bn.running_mean, bn.running_var, bn.eps)
    assert jnp.allclose(out_eval, ref_eval, atol=1e-5, rtol=1e-5)

    # ---- case 2: fused path, multi-block channel grid with partial last block ----
    B2, C2, H2, W2 = 2, 12, 16, 16
    x2 = jax.random.normal(kx2, (B2, C2, H2, W2), jnp.float32)
    w2 = jax.random.normal(kw2, (C2,), jnp.float32) * 0.5 + 1.0
    b2 = jax.random.normal(kb2, (C2,), jnp.float32) * 0.1

    out2, m2, v2 = batchnorm2d_train_fwd(x2, w2, b2, 1e-5, c_tile=8)
    out2 = jax.block_until_ready(out2)
    assert jnp.allclose(out2, _reference_train(x2, w2, b2, 1e-5), atol=1e-5, rtol=1e-5)
    assert jnp.allclose(m2, jnp.mean(x2, axis=(0, 2, 3)), atol=1e-5)
    assert jnp.allclose(v2, jnp.var(x2, axis=(0, 2, 3)), atol=1e-5)

    rm2 = jnp.mean(x2, axis=(0, 2, 3)) * 0.3
    rv2 = jnp.var(x2, axis=(0, 2, 3)) * 0.7 + 0.3
    oe2 = jax.block_until_ready(
        batchnorm2d_eval_fwd(x2, w2, b2, rm2, rv2, 1e-5, c_tile=8, hw_tile=128))
    assert jnp.allclose(oe2, _reference_eval(x2, w2, b2, rm2, rv2, 1e-5),
                        atol=1e-5, rtol=1e-5)

    # ---- case 3: forced two-pass (stats accumulation over HW tiles) ----
    out3, m3, v3 = batchnorm2d_train_fwd(x2, w2, b2, 1e-5, c_tile=8, hw_tile=128)
    out3 = jax.block_until_ready(out3)
    assert jnp.allclose(out3, _reference_train(x2, w2, b2, 1e-5), atol=1e-5, rtol=1e-5)
    assert jnp.allclose(m3, jnp.mean(x2, axis=(0, 2, 3)), atol=1e-5)
    assert jnp.allclose(v3, jnp.var(x2, axis=(0, 2, 3)), atol=1e-5)

    # ---- case 4: two-pass with a partial (masked) last HW tile ----
    B4, C4, H4, W4 = 2, 8, 12, 12   # HW = 144, hw_tile = 128 -> masked remainder
    x4 = jax.random.normal(kx3, (B4, C4, H4, W4), jnp.float32)
    w4 = jax.random.normal(kw3, (C4,), jnp.float32) * 0.5 + 1.0
    b4 = jax.random.normal(kb3, (C4,), jnp.float32) * 0.1

    out4, m4, v4 = batchnorm2d_train_fwd(x4, w4, b4, 1e-5, hw_tile=128)
    out4 = jax.block_until_ready(out4)
    assert jnp.allclose(out4, _reference_train(x4, w4, b4, 1e-5), atol=1e-5, rtol=1e-5)
    assert jnp.allclose(m4, jnp.mean(x4, axis=(0, 2, 3)), atol=1e-5)
    assert jnp.allclose(v4, jnp.var(x4, axis=(0, 2, 3)), atol=1e-5)

    print("KERNEL_OK")
</pallas_src>

<mosaic_0001>
module attributes {stable_mosaic.version = 11 : i64} {
  func.func @_bn_train_kernel(%arg0: i32, %arg1: memref<2x4x256xf32, #tpu.memory_space<vmem>>, %arg2: memref<4x1xf32, #tpu.memory_space<vmem>>, %arg3: memref<4x1xf32, #tpu.memory_space<vmem>>, %arg4: memref<2x4x256xf32, #tpu.memory_space<vmem>>, %arg5: memref<4x1xf32, #tpu.memory_space<vmem>>, %arg6: memref<4x1xf32, #tpu.memory_space<vmem>>) attributes {dimension_semantics = [#tpu.dimension_semantics<parallel>], iteration_bounds = array<i64: 1>, scalar_prefetch = 0 : i64, scratch_operands = 0 : i64, tpu.core_type = #tpu.core_type<tc>, window_params = [{transform_indices = @transform_0, window_bounds = array<i64: 2, 4, 256>}, {transform_indices = @transform_1, window_bounds = array<i64: 4, 1>}, {transform_indices = @transform_2, window_bounds = array<i64: 4, 1>}, {transform_indices = @transform_3, window_bounds = array<i64: 2, 4, 256>}, {transform_indices = @transform_4, window_bounds = array<i64: 4, 1>}, {transform_indices = @transform_5, window_bounds = array<i64: 4, 1>}]} {
    %c0 = arith.constant 0 : index
    %c0_0 = arith.constant 0 : index
    %c0_1 = arith.constant 0 : index
    %0 = vector.load %arg1[%c0, %c0_0, %c0_1] : memref<2x4x256xf32, #tpu.memory_space<vmem>>, vector<2x4x256xf32>
    %cst = arith.constant dense<0.000000e+00> : vector<4xf32>
    %1 = vector.multi_reduction <add>, %0, %cst [0, 2] : vector<2x4x256xf32> to vector<4xf32>
    %2 = vector.shape_cast %1 : vector<4xf32> to vector<1x4x1xf32>
    %cst_2 = arith.constant 0.001953125 : f32
    %3 = vector.broadcast %cst_2 : f32 to vector<1x4x1xf32>
    %4 = arith.mulf %2, %3 : vector<1x4x1xf32>
    %5 = arith.mulf %0, %0 : vector<2x4x256xf32>
    %cst_3 = arith.constant dense<0.000000e+00> : vector<4xf32>
    %6 = vector.multi_reduction <add>, %5, %cst_3 [0, 2] : vector<2x4x256xf32> to vector<4xf32>
    %7 = vector.shape_cast %6 : vector<4xf32> to vector<1x4x1xf32>
    %cst_4 = arith.constant 0.001953125 : f32
    %8 = vector.broadcast %cst_4 : f32 to vector<1x4x1xf32>
    %9 = arith.mulf %7, %8 : vector<1x4x1xf32>
    %10 = arith.mulf %4, %4 : vector<1x4x1xf32>
    %11 = arith.subf %9, %10 : vector<1x4x1xf32>
    %cst_5 = arith.constant 0.000000e+00 : f32
    %12 = vector.broadcast %cst_5 : f32 to vector<1x4x1xf32>
    %13 = arith.maximumf %11, %12 : vector<1x4x1xf32>
    %cst_6 = arith.constant 9.99999974E-6 : f32
    %14 = vector.broadcast %cst_6 : f32 to vector<1x4x1xf32>
    %15 = arith.addf %13, %14 : vector<1x4x1xf32>
    %16 = math.rsqrt %15 : vector<1x4x1xf32>
    %c0_7 = arith.constant 0 : index
    %c0_8 = arith.constant 0 : index
    %17 = vector.load %arg2[%c0_7, %c0_8] : memref<4x1xf32, #tpu.memory_space<vmem>>, vector<4x1xf32>
    %18 = vector.shape_cast %17 : vector<4x1xf32> to vector<1x4x1xf32>
    %19 = arith.mulf %18, %16 : vector<1x4x1xf32>
    %c0_9 = arith.constant 0 : index
    %c0_10 = arith.constant 0 : index
    %20 = vector.load %arg3[%c0_9, %c0_10] : memref<4x1xf32, #tpu.memory_space<vmem>>, vector<4x1xf32>
    %21 = arith.mulf %4, %19 : vector<1x4x1xf32>
    %22 = vector.shape_cast %20 : vector<4x1xf32> to vector<1x4x1xf32>
    %23 = arith.subf %22, %21 : vector<1x4x1xf32>
    %24 = vector.broadcast %19 : vector<1x4x1xf32> to vector<2x4x256xf32>
    %25 = arith.mulf %0, %24 : vector<2x4x256xf32>
    %26 = vector.broadcast %23 : vector<1x4x1xf32> to vector<2x4x256xf32>
    %27 = arith.addf %25, %26 : vector<2x4x256xf32>
    %c0_11 = arith.constant 0 : index
    %c0_12 = arith.constant 0 : index
    %c0_13 = arith.constant 0 : index
    %28 = vector.load %arg4[%c0_11, %c0_12, %c0_13] : memref<2x4x256xf32, #tpu.memory_space<vmem>>, vector<2x4x256xf32>
    tpu.vector_store %arg4[%c0_11, %c0_12, %c0_13], %27 {strides = array<i32>} : memref<2x4x256xf32, #tpu.memory_space<vmem>>, vector<2x4x256xf32>,
    %29 = vector.shape_cast %4 : vector<1x4x1xf32> to vector<4x1xf32>
    %c0_14 = arith.constant 0 : index
    %c0_15 = arith.constant 0 : index
    %30 = vector.load %arg5[%c0_14, %c0_15] : memref<4x1xf32, #tpu.memory_space<vmem>>, vector<4x1xf32>
    tpu.vector_store %arg5[%c0_14, %c0_15], %29 {strides = array<i32>} : memref<4x1xf32, #tpu.memory_space<vmem>>, vector<4x1xf32>,
    %31 = vector.shape_cast %13 : vector<1x4x1xf32> to vector<4x1xf32>
    %c0_16 = arith.constant 0 : index
    %c0_17 = arith.constant 0 : index
    %32 = vector.load %arg6[%c0_16, %c0_17] : memref<4x1xf32, #tpu.memory_space<vmem>>, vector<4x1xf32>
    tpu.vector_store %arg6[%c0_16, %c0_17], %31 {strides = array<i32>} : memref<4x1xf32, #tpu.memory_space<vmem>>, vector<4x1xf32>,
    return
  }
  func.func @transform_0(%arg0: i32) -> (i32, i32, i32) {
    %c0_i32 = arith.constant 0 : i32
    %c0_i32_0 = arith.constant 0 : i32
    %c0_i32_1 = arith.constant 0 : i32
    return %c0_i32, %arg0, %c0_i32_0 : i32, i32, i32
  }
  func.func @transform_1(%arg0: i32) -> (i32, i32) {
    %c0_i32 = arith.constant 0 : i32
    %c0_i32_0 = arith.constant 0 : i32
    return %arg0, %c0_i32 : i32, i32
  }
  func.func @transform_2(%arg0: i32) -> (i32, i32) {
    %c0_i32 = arith.constant 0 : i32
    %c0_i32_0 = arith.constant 0 : i32
    return %arg0, %c0_i32 : i32, i32
  }
  func.func @transform_3(%arg0: i32) -> (i32, i32, i32) {
    %c0_i32 = arith.constant 0 : i32
    %c0_i32_0 = arith.constant 0 : i32
    %c0_i32_1 = arith.constant 0 : i32
    return %c0_i32, %arg0, %c0_i32_0 : i32, i32, i32
  }
  func.func @transform_4(%arg0: i32) -> (i32, i32) {
    %c0_i32 = arith.constant 0 : i32
    %c0_i32_0 = arith.constant 0 : i32
    return %arg0, %c0_i32 : i32, i32
  }
  func.func @transform_5(%arg0: i32) -> (i32, i32) {
    %c0_i32 = arith.constant 0 : i32
    %c0_i32_0 = arith.constant 0 : i32
    return %arg0, %c0_i32 : i32, i32
  }
}

</mosaic_0001>

<bundles_post_ra>
// kernel: tpu_custom_call.1
= control target key start
LH: loop header
LB: loop body
LE: loop exit
PB: predicated region body
PF: predicated region fallthrough
CT: control target
= control target key end

     0   :  { %11 = vsyncpa [#allocation3], 0  ;;  %s283_s0 = inlined_call_operand.hbm [shape: f32[2,4,256], index: 0, kind: input, shape index: {}]   ;;  %s284_s1 = inlined_call_operand.vmem [shape: f32[4,1], index: 1, kind: input, shape index: {}]   ;;  %s285_s2 = inlined_call_operand.vmem [shape: f32[4,1], index: 2, kind: input, shape index: {}]   ;;  %s286_s3 = inlined_call_operand.hbm [shape: f32[2,4,256], index: 3, kind: output, shape index: {0}]   ;;  %s287_s4 = inlined_call_operand.vmem [shape: f32[4,1], index: 4, kind: output, shape index: {1}]   ;;  %s288_s5 = inlined_call_operand.vmem [shape: f32[4,1], index: 5, kind: output, shape index: {2}]  }
   0x1   :  { %12 = vsyncpa [#allocation4], 0  ;;  %s197_s18 = smov [#allocation2]   ;;  %s149_s22 = scalar_lea.hbm %s283_s0, 256 }
   0x2   :  { %s18_s19 = sshll.u32 %s197_s18, 4  ;;  %p150_p0 = scmp.ne.s32.totalorder %s283_s0, %s149_s22  ;;  %s19_s19 = int_to_ptr.vmem [resolvable:$true] %s18_s19 }
   0x3   :  { %p153_p1 = scmp.lt.u32.totalorder %s149_s22, %s283_s0 }
   0x5   :  { %p155_p2 = pnand %p153_p1, %p150_p0 }
   0x7   :  { %158 = shalt.err (!%p155_p2)
}
   0x8   :  { %s159_s27 = scalar_lea.vmem %s19_s19, 256  ;;  %p164_p4 = scmp.lt.s32.totalorder %s19_s19, %s19_s19 }
   0x9   :  { %p160_p3 = scmp.ne.s32.totalorder %s19_s19, %s159_s27  ;;  %p165_p5 = scmp.lt.s32.totalorder %s159_s27, %s159_s27 }
   0xb   :  { %p166_p6 = por %p165_p5, %p164_p4 }
   0xd   :  { %p167_p7 = pnand %p166_p6, %p160_p3 }
   0xf   :  { %170 = shalt.err (!%p167_p7)
}
  0x10   :  { %s198_s28 = smov 128   ;;  %s199_s29 = smov 8  }
  0x11   :  { %24 = dma.hbm_to_vmem [thread:$0]  %s283_s0, 256, %s19_s19, [#allocation3], %s198_s28, %s198_s28, %s199_s29  }
  0x12   :  { %193 = dma.done.wait [#allocation3], 256  }
  0x13   :  { %194 = vsyncadd [#allocation3], 4294967040  ;;  %vm40_vm0 = vcmask 1043456   ;;  %v32_v0 = vld [vmem:[#allocation2] sm:$0xff]  ;;  %v33_v1 = vld [vmem:[#allocation2 + $0x8] sm:$0xff]  ;;  %v200_v22 = vmov 0   ;;  %v86_v39 = vlaneseq }
  0x14   :  { %v36_v2 = vcombine.high %v32_v0, %v32_v0  ;;  %v37_v3 = vcombine.high %v33_v1, %v33_v1  ;;  %v41_v4 = vsel %vm40_vm0, %v32_v0, 0.0  ;;  %v51_v5 = vmul.f32 %v32_v0, %v32_v0  ;;  %143 = vset.pattern.permute.xlu1 %v200_v22  ;;  %144 = vset.pattern.permute.xlu0 %v200_v22  ;;  %v74_v31 = vld [vmem:[%s284_s1] sm:$0xf]  ;;  %s202_s1 = smov [#allocation5]  }
  0x15   :  { %v52_v6 = vmul.f32 %v33_v1, %v33_v1  ;;  %v44_v8 = vsel %vm40_vm0, %v33_v1, 0.0  ;;  %vm109_vm1 = vcmask 3072   ;;  %v76_v34 = vld [vmem:[%s285_s2] sm:$0xf]  ;;  %v201_v37 = vmov 839922192  }
  0x16   :  { %v42_v7 = vsel %vm40_vm0, %v36_v2, 0.0  ;;  %v55_v10 = vcombine.high %v51_v5, %v51_v5  ;;  %v59_v12 = vsel %vm40_vm0, %v51_v5, 0.0  ;;  %v46_v13 = vsel %vm40_vm0, %v37_v3, 0.0 }
  0x17   :  { %v43_v9 = vadd.f32 %v42_v7, %v41_v4  ;;  %v56_v11 = vcombine.high %v52_v6, %v52_v6  ;;  %v62_v16 = vsel %vm40_vm0, %v52_v6, 0.0  ;;  %v84_v38 = vunpack.c.l.s4 %v201_v37 }
  0x18   :  { %v60_v15 = vsel %vm40_vm0, %v55_v10, 0.0  ;;  %v87_v41 = vshrl.u32 %v86_v39, 7 }
  0x19   :  { %v45_v14 = vadd.f32 %v44_v8, %v43_v9  ;;  %v61_v17 = vadd.f32 %v60_v15, %v59_v12  ;;  %v64_v19 = vsel %vm40_vm0, %v56_v11, 0.0  ;;  %v85_v40 = vunpack.c.0.s8 %v84_v38 }
  0x1b   :  { %v47_v18 = vadd.f32 %v46_v13, %v45_v14  ;;  %v63_v20 = vadd.f32 %v62_v16, %v61_v17  ;;  %v88_v42 = vsub.s32 %v85_v40, %v87_v41 }
  0x1d   :  { %48 = vadd.xlane.f32.xlu0 %v47_v18  ;;  %v65_v21 = vadd.f32 %v64_v19, %v63_v20 }
  0x21   :  { %66 = vadd.xlane.f32.xlu0 %v65_v21 }
  0xaa   :  { %v49_v23 = vpop.xlane.xlu0 %48 }
  0xab   :  { %v50_v24 = vmul.f32 0.001953125, %v49_v23 }
  0xad   :  { %110 = vst.msk [vmem:[%s287_s4] sm:$0xf] %vm109_vm1, %v50_v24  ;;  %v69_v26 = vmul.f32 %v50_v24, %v50_v24  ;;  %s117_s4 = sshll.u32 %s202_s1, 4  ;;  %s118_s4 = int_to_ptr.vmem [resolvable:$true] %s117_s4 }
  0xae   :  { %v67_v25 = vpop.xlane.xlu0 %66  ;;  %s171_s2 = scalar_lea.vmem %s118_s4, 256  ;;  %p176_p9 = scmp.lt.s32.totalorder %s118_s4, %s118_s4 }
  0xaf   :  { %v68_v27 = vmul.f32 0.001953125, %v67_v25  ;;  %p172_p8 = scmp.ne.s32.totalorder %s118_s4, %s171_s2  ;;  %p177_p10 = scmp.lt.s32.totalorder %s171_s2, %s171_s2 }
  0xb1   :  { %v70_v28 = vsub.f32 %v68_v27, %v69_v26  ;;  %p178_p11 = por %p177_p10, %p176_p9 }
  0xb3   :  { %v71_v29 = vmax.f32 %v70_v28, 0.0  ;;  %p179_p12 = pnand %p178_p11, %p172_p8 }
  0xb5   :  { %v72_v30 = vadd.f32 1e-05, %v71_v29  ;;  %111 = vst.msk [vmem:[%s288_s5] sm:$0xf] %vm109_vm1, %v71_v29 }
  0xb7   :  { %147 = vrsqrt.f32 %v72_v30 }
  0xc1   :  { %v148_v32 = vpop.eup %147 }
  0xc2   :  { %v75_v33 = vmul.f32 %v148_v32, %v74_v31 }
  0xc4   :  { %81 = vperm.xlu1 %143, %v75_v33   ;;  %v77_v35 = vmul.f32 %v75_v33, %v50_v24 }
  0xc6   :  { %v78_v36 = vsub.f32 %v76_v34, %v77_v35 }
  0xc8   :  { %95 = vperm.xlu1 %143, %v78_v36  }
 0x143   :  { %v82_v43 = vpop.permute.xlu1 %81 }
 0x144   :  { %v89_v44 = vrot.slane %v82_v43, %v88_v42 }
 0x146   :  { %v91_v46 = vmul.f32 %v89_v44, %v32_v0  ;;  %v92_v47 = vmul.f32 %v89_v44, %v33_v1 }
 0x147   :  { %v96_v45 = vpop.permute.xlu1 %95 }
 0x148   :  { %v103_v48 = vrot.slane %v96_v45, %v88_v42 }
 0x14a   :  { %v105_v49 = vadd.f32 %v103_v48, %v91_v46  ;;  %v106_v50 = vadd.f32 %v103_v48, %v92_v47 }
 0x14c   :  { %107 = vst [vmem:[#allocation5] sm:$0xff] %v105_v49  ;;  %108 = vst [vmem:[#allocation5 + $0x8] sm:$0xff] %v106_v50 }
 0x14d   :  { %182 = shalt.err (!%p179_p12)
}
 0x14e   :  { %s183_s15 = scalar_lea.hbm %s286_s3, 256 }
 0x14f   :  { %p184_p13 = scmp.ne.s32.totalorder %s286_s3, %s183_s15  ;;  %p187_p0 = scmp.lt.u32.totalorder %s183_s15, %s286_s3 }
 0x151   :  { %p189_p1 = pnand %p187_p0, %p184_p13 }
 0x153   :  { %192 = shalt.err (!%p189_p1)
}
 0x154   :  { %123 = dma.vmem_to_hbm [thread:$0]  %s118_s4, 256, %s286_s3, [#allocation4], %s198_s28, %s198_s28, %s199_s29  }
 0x155   :  { %195 = dma.done.wait [#allocation4], 256  }
 0x156   :  { %196 = vsyncadd [#allocation4], 4294967040 }
 0x157   :  { %135 = vsyncpa [#allocation3], 1 }
 0x158   :  { %136 = vsyncpa [#allocation4], 1 }

</bundles_post_ra>
